<compile_context>
chip_gen: v5e
topology: v5e:2x2
jax: 0.10.0
libtpu: 0.0.40
codegen_flags: <defaults>
</compile_context>

<pallas_src>
import jax
import jax.numpy as jnp
from jax.experimental import pallas as pl
from jax.experimental.pallas import tpu as pltpu

K = 7               # conv kernel size
PAD = (K - 1) // 2  # "same" padding


def _conv_to_toeplitz(w2d, H, W):
    """(K, K) taps -> (H*W, H*W) matrix A with  out_flat = in_flat @ A.

    Encodes the zero-padded 7x7 cross-correlation (PyTorch Conv2d semantics),
    boundary masking included, so the kernel's conv is a single MXU matmul on
    the lane-dense flat layout.
    """
    HW = H * W
    idx = jnp.arange(HW)
    row, col = idx // W, idx % W
    # A[q, p] = contribution of flat source pixel q to flat output pixel p.
    dy = row[:, None] - row[None, :] + PAD           # (HW, HW)
    dx = col[:, None] - col[None, :] + PAD
    valid = (dy >= 0) & (dy < K) & (dx >= 0) & (dx < K)
    taps = w2d[jnp.clip(dy, 0, K - 1), jnp.clip(dx, 0, K - 1)]
    return jnp.where(valid, taps, 0.0).astype(jnp.float32)


def _pick_block_batch(N, C, HW, dtype, budget_bytes):
    """Batch elements per grid step, derived from a VMEM block budget."""
    elem = jnp.dtype(dtype).itemsize
    per_batch = 2 * C * HW * elem                  # x block + out block
    nb = max(1, min(N, budget_bytes // (2 * per_batch)))   # /2: double-buffered
    # v7x has 2 TensorCores: keep >=2 parallel grid steps when N allows so the
    # second core is not idle (harmless on single-core v5e/v6e).
    if nb >= N and N > 1:
        nb = (N + 1) // 2
    while N % nb:                                  # avoid padded trailing blocks
        nb -= 1
    return nb


def spatial_gate_kernel(bn_ref, a_max_ref, a_mean_ref, x_ref, o_ref):
    # bn_ref    : SMEM (1,) f32       folded BatchNorm shift
    # a_max_ref : VMEM (HW, HW) f32   Toeplitz conv matrix, max-pool channel
    # a_mean_ref: VMEM (HW, HW) f32   Toeplitz conv matrix, mean-pool channel
    #                                 (BN scale and 1/C already folded in)
    # x_ref     : VMEM (Nb, C, HW)    lane-dense input block
    # o_ref     : VMEM (Nb, C, HW)
    _, C, _ = x_ref.shape

    # ChannelPool, fused: a single pass over C computes both max and sum.
    x0 = x_ref[:, 0, :].astype(jnp.float32)          # (Nb, HW)
    mx = x0
    sm = x0
    for c in range(1, C):
        xc = x_ref[:, c, :].astype(jnp.float32)
        mx = jnp.maximum(mx, xc)
        sm = sm + xc                                  # 1/C folded into a_mean

    # 7x7 conv + BatchNorm(eval), folded: two MXU matmuls + a scalar shift.
    acc = jnp.dot(mx, a_max_ref[...], preferred_element_type=jnp.float32)
    acc = acc + jnp.dot(sm, a_mean_ref[...], preferred_element_type=jnp.float32)
    scale = jax.nn.sigmoid(acc + bn_ref[0])          # (Nb, HW)

    # Gating epilogue: per-channel re-read of x, lane-dense full-width stores.
    for c in range(C):
        xc = x_ref[:, c, :].astype(jnp.float32)
        o_ref[:, c, :] = (xc * scale).astype(o_ref.dtype)


def spatial_gate(x, conv_w, bn_gamma, bn_beta, bn_mean, bn_var, eps=1e-5,
                 vmem_block_budget_bytes=4 * 1024 * 1024):
    N, C, H, W = x.shape
    HW = H * W
    x_flat = x.reshape(N, C, HW)       # lane-dense view (HW = 256 for 16x16)

    # Fold eval-mode BatchNorm2d(1) and the mean pool's 1/C into the conv
    # weights; the kernel only adds bn_shift before the sigmoid.
    bn_scale = bn_gamma[0] / jnp.sqrt(bn_var[0] + eps)
    bn_shift = jnp.reshape(bn_beta[0] - bn_mean[0] * bn_scale, (1,))
    bn_shift = bn_shift.astype(jnp.float32)
    w = conv_w.astype(jnp.float32)                   # (1, 2, K, K)
    a_max = _conv_to_toeplitz(w[0, 0] * bn_scale, H, W)
    a_mean = _conv_to_toeplitz(w[0, 1] * (bn_scale / C), H, W)

    nb = _pick_block_batch(N, C, HW, x.dtype, vmem_block_budget_bytes)
    grid = (N // nb,)

    out_flat = pl.pallas_call(
        spatial_gate_kernel,
        out_shape=jax.ShapeDtypeStruct((N, C, HW), x.dtype),
        grid_spec=pltpu.PrefetchScalarGridSpec(
            num_scalar_prefetch=0,
            grid=grid,
            in_specs=[
                pl.BlockSpec(memory_space=pltpu.MemorySpace.SMEM),  # bn_shift
                pl.BlockSpec((HW, HW), lambda n: (0, 0)),           # a_max
                pl.BlockSpec((HW, HW), lambda n: (0, 0)),           # a_mean
                pl.BlockSpec((nb, C, HW), lambda n: (n, 0, 0)),     # x
            ],
            out_specs=pl.BlockSpec((nb, C, HW), lambda n: (n, 0, 0)),
        ),
        compiler_params=pltpu.CompilerParams(
            dimension_semantics=("parallel",)),
    )(bn_shift, a_max, a_mean, x_flat)
    return out_flat.reshape(N, C, H, W)


def spatial_gate_reference(x, conv_w, bn_gamma, bn_beta, bn_mean, bn_var,
                           eps=1e-5):
    """Pure-JAX reference (NCHW), used only to sanity-check the kernel."""
    mx = jnp.max(x, axis=1, keepdims=True)
    mean = jnp.mean(x, axis=1, keepdims=True)
    pooled = jnp.concatenate([mx, mean], axis=1)             # (N, 2, H, W)
    conv = jax.lax.conv_general_dilated(
        pooled, conv_w, window_strides=(1, 1), padding=((PAD, PAD), (PAD, PAD)),
        dimension_numbers=("NCHW", "OIHW", "NCHW"))
    bn = (conv - bn_mean[None, :, None, None]) / jnp.sqrt(
        bn_var[None, :, None, None] + eps)
    bn = bn * bn_gamma[None, :, None, None] + bn_beta[None, :, None, None]
    return x * jax.nn.sigmoid(bn)


if __name__ == "__main__":
    key = jax.random.PRNGKey(0)
    k_x, k_w = jax.random.split(key)

    N, C, H, W = 2, 4, 16, 16
    x = jax.random.normal(k_x, (N, C, H, W), dtype=jnp.float32)

    # Conv2d(2, 1, 7, padding=3, bias=False) weight, kaiming-uniform-like init.
    fan_in = 2 * K * K
    bound = 1.0 / (fan_in ** 0.5)
    conv_w = jax.random.uniform(k_w, (1, 2, K, K), dtype=jnp.float32,
                                minval=-bound, maxval=bound)

    # BatchNorm2d(1): fresh init (eval mode).
    bn_gamma = jnp.ones((1,), jnp.float32)
    bn_beta = jnp.zeros((1,), jnp.float32)
    bn_mean = jnp.zeros((1,), jnp.float32)
    bn_var = jnp.ones((1,), jnp.float32)

    out = spatial_gate(x, conv_w, bn_gamma, bn_beta, bn_mean, bn_var)
    out = jax.block_until_ready(out)

    ref = spatial_gate_reference(x, conv_w, bn_gamma, bn_beta, bn_mean, bn_var)
    assert out.shape == x.shape
    err = float(jnp.max(jnp.abs(out - ref)))
    # Tolerance covers MXU f32 pass rounding on the conv matmuls.
    assert jnp.allclose(out, ref, atol=2e-3, rtol=2e-3), err

    print("KERNEL_OK")
</pallas_src>

<mosaic_0001>
module attributes {stable_mosaic.version = 11 : i64} {
  func.func @spatial_gate_kernel(%arg0: i32, %arg1: memref<1xf32, #tpu.memory_space<smem>>, %arg2: memref<256x256xf32, #tpu.memory_space<vmem>>, %arg3: memref<256x256xf32, #tpu.memory_space<vmem>>, %arg4: memref<1x4x256xf32, #tpu.memory_space<vmem>>, %arg5: memref<1x4x256xf32, #tpu.memory_space<vmem>>) attributes {dimension_semantics = [#tpu.dimension_semantics<parallel>], iteration_bounds = array<i64: 2>, scalar_prefetch = 0 : i64, scratch_operands = 0 : i64, tpu.core_type = #tpu.core_type<tc>, window_params = [{transform_indices = @transform_0, window_bounds = array<i64: 1>}, {pipeline_mode = #tpu.pipeline_mode<synchronous>, transform_indices = @transform_1, window_bounds = array<i64: 256, 256>}, {pipeline_mode = #tpu.pipeline_mode<synchronous>, transform_indices = @transform_2, window_bounds = array<i64: 256, 256>}, {transform_indices = @transform_3, window_bounds = array<i64: 1, 4, 256>}, {transform_indices = @transform_4, window_bounds = array<i64: 1, 4, 256>}]} {
    %c0 = arith.constant 0 : index
    %c0_0 = arith.constant 0 : index
    %c0_1 = arith.constant 0 : index
    %0 = vector.load %arg4[%c0, %c0_0, %c0_1] : memref<1x4x256xf32, #tpu.memory_space<vmem>>, vector<1x1x256xf32>
    %1 = vector.shape_cast %0 : vector<1x1x256xf32> to vector<1x256xf32>
    %c0_2 = arith.constant 0 : index
    %c1 = arith.constant 1 : index
    %c0_3 = arith.constant 0 : index
    %2 = vector.load %arg4[%c0_2, %c1, %c0_3] : memref<1x4x256xf32, #tpu.memory_space<vmem>>, vector<1x1x256xf32>
    %3 = vector.shape_cast %2 : vector<1x1x256xf32> to vector<1x256xf32>
    %4 = arith.maximumf %1, %3 : vector<1x256xf32>
    %5 = arith.addf %1, %3 : vector<1x256xf32>
    %c0_4 = arith.constant 0 : index
    %c2 = arith.constant 2 : index
    %c0_5 = arith.constant 0 : index
    %6 = vector.load %arg4[%c0_4, %c2, %c0_5] : memref<1x4x256xf32, #tpu.memory_space<vmem>>, vector<1x1x256xf32>
    %7 = vector.shape_cast %6 : vector<1x1x256xf32> to vector<1x256xf32>
    %8 = arith.maximumf %4, %7 : vector<1x256xf32>
    %9 = arith.addf %5, %7 : vector<1x256xf32>
    %c0_6 = arith.constant 0 : index
    %c3 = arith.constant 3 : index
    %c0_7 = arith.constant 0 : index
    %10 = vector.load %arg4[%c0_6, %c3, %c0_7] : memref<1x4x256xf32, #tpu.memory_space<vmem>>, vector<1x1x256xf32>
    %11 = vector.shape_cast %10 : vector<1x1x256xf32> to vector<1x256xf32>
    %12 = arith.maximumf %8, %11 : vector<1x256xf32>
    %13 = arith.addf %9, %11 : vector<1x256xf32>
    %c0_8 = arith.constant 0 : index
    %c0_9 = arith.constant 0 : index
    %14 = vector.load %arg2[%c0_8, %c0_9] : memref<256x256xf32, #tpu.memory_space<vmem>>, vector<256x256xf32>
    %cst = arith.constant dense<0.000000e+00> : vector<1x256xf32>
    %15 = tpu.matmul %12, %14, %cst {dimension_numbers = #tpu.dot_dimension_numbers<[1], [0], [0], [1], [0, 0, 1, 1], [], []>} : vector<1x256xf32>, vector<256x256xf32>, vector<1x256xf32> -> vector<1x256xf32>
    %c0_10 = arith.constant 0 : index
    %c0_11 = arith.constant 0 : index
    %16 = vector.load %arg3[%c0_10, %c0_11] : memref<256x256xf32, #tpu.memory_space<vmem>>, vector<256x256xf32>
    %cst_12 = arith.constant dense<0.000000e+00> : vector<1x256xf32>
    %17 = tpu.matmul %13, %16, %cst_12 {dimension_numbers = #tpu.dot_dimension_numbers<[1], [0], [0], [1], [0, 0, 1, 1], [], []>} : vector<1x256xf32>, vector<256x256xf32>, vector<1x256xf32> -> vector<1x256xf32>
    %18 = arith.addf %15, %17 : vector<1x256xf32>
    %c0_13 = arith.constant 0 : index
    %19 = memref.load %arg1[%c0_13] : memref<1xf32, #tpu.memory_space<smem>>
    %20 = vector.broadcast %19 : f32 to vector<1x256xf32>
    %21 = arith.addf %18, %20 : vector<1x256xf32>
    %22 = arith.negf %21 : vector<1x256xf32>
    %23 = math.exp %22 : vector<1x256xf32>
    %cst_14 = arith.constant 1.000000e+00 : f32
    %24 = vector.broadcast %cst_14 : f32 to vector<1x256xf32>
    %25 = arith.addf %24, %23 : vector<1x256xf32>
    %26 = arith.divf %24, %25 : vector<1x256xf32>
    %c0_15 = arith.constant 0 : index
    %c0_16 = arith.constant 0 : index
    %c0_17 = arith.constant 0 : index
    %27 = vector.load %arg4[%c0_15, %c0_16, %c0_17] : memref<1x4x256xf32, #tpu.memory_space<vmem>>, vector<1x1x256xf32>
    %28 = vector.shape_cast %27 : vector<1x1x256xf32> to vector<1x256xf32>
    %29 = arith.mulf %28, %26 : vector<1x256xf32>
    %c0_18 = arith.constant 0 : index
    %c0_19 = arith.constant 0 : index
    %c0_20 = arith.constant 0 : index
    %30 = vector.load %arg5[%c0_18, %c0_19, %c0_20] : memref<1x4x256xf32, #tpu.memory_space<vmem>>, vector<1x1x256xf32>
    %31 = vector.shape_cast %30 : vector<1x1x256xf32> to vector<1x256xf32>
    %32 = vector.shape_cast %29 : vector<1x256xf32> to vector<1x1x256xf32>
    tpu.vector_store %arg5[%c0_18, %c0_19, %c0_20], %32 {strides = array<i32>} : memref<1x4x256xf32, #tpu.memory_space<vmem>>, vector<1x1x256xf32>,
    %c0_21 = arith.constant 0 : index
    %c1_22 = arith.constant 1 : index
    %c0_23 = arith.constant 0 : index
    %33 = vector.load %arg4[%c0_21, %c1_22, %c0_23] : memref<1x4x256xf32, #tpu.memory_space<vmem>>, vector<1x1x256xf32>
    %34 = vector.shape_cast %33 : vector<1x1x256xf32> to vector<1x256xf32>
    %35 = arith.mulf %34, %26 : vector<1x256xf32>
    %c0_24 = arith.constant 0 : index
    %c1_25 = arith.constant 1 : index
    %c0_26 = arith.constant 0 : index
    %36 = vector.load %arg5[%c0_24, %c1_25, %c0_26] : memref<1x4x256xf32, #tpu.memory_space<vmem>>, vector<1x1x256xf32>
    %37 = vector.shape_cast %36 : vector<1x1x256xf32> to vector<1x256xf32>
    %38 = vector.shape_cast %35 : vector<1x256xf32> to vector<1x1x256xf32>
    tpu.vector_store %arg5[%c0_24, %c1_25, %c0_26], %38 {strides = array<i32>} : memref<1x4x256xf32, #tpu.memory_space<vmem>>, vector<1x1x256xf32>,
    %c0_27 = arith.constant 0 : index
    %c2_28 = arith.constant 2 : index
    %c0_29 = arith.constant 0 : index
    %39 = vector.load %arg4[%c0_27, %c2_28, %c0_29] : memref<1x4x256xf32, #tpu.memory_space<vmem>>, vector<1x1x256xf32>
    %40 = vector.shape_cast %39 : vector<1x1x256xf32> to vector<1x256xf32>
    %41 = arith.mulf %40, %26 : vector<1x256xf32>
    %c0_30 = arith.constant 0 : index
    %c2_31 = arith.constant 2 : index
    %c0_32 = arith.constant 0 : index
    %42 = vector.load %arg5[%c0_30, %c2_31, %c0_32] : memref<1x4x256xf32, #tpu.memory_space<vmem>>, vector<1x1x256xf32>
    %43 = vector.shape_cast %42 : vector<1x1x256xf32> to vector<1x256xf32>
    %44 = vector.shape_cast %41 : vector<1x256xf32> to vector<1x1x256xf32>
    tpu.vector_store %arg5[%c0_30, %c2_31, %c0_32], %44 {strides = array<i32>} : memref<1x4x256xf32, #tpu.memory_space<vmem>>, vector<1x1x256xf32>,
    %c0_33 = arith.constant 0 : index
    %c3_34 = arith.constant 3 : index
    %c0_35 = arith.constant 0 : index
    %45 = vector.load %arg4[%c0_33, %c3_34, %c0_35] : memref<1x4x256xf32, #tpu.memory_space<vmem>>, vector<1x1x256xf32>
    %46 = vector.shape_cast %45 : vector<1x1x256xf32> to vector<1x256xf32>
    %47 = arith.mulf %46, %26 : vector<1x256xf32>
    %c0_36 = arith.constant 0 : index
    %c3_37 = arith.constant 3 : index
    %c0_38 = arith.constant 0 : index
    %48 = vector.load %arg5[%c0_36, %c3_37, %c0_38] : memref<1x4x256xf32, #tpu.memory_space<vmem>>, vector<1x1x256xf32>
    %49 = vector.shape_cast %48 : vector<1x1x256xf32> to vector<1x256xf32>
    %50 = vector.shape_cast %47 : vector<1x256xf32> to vector<1x1x256xf32>
    tpu.vector_store %arg5[%c0_36, %c3_37, %c0_38], %50 {strides = array<i32>} : memref<1x4x256xf32, #tpu.memory_space<vmem>>, vector<1x1x256xf32>,
    return
  }
  func.func @transform_0(%arg0: i32) -> i32 {
    %c0_i32 = arith.constant 0 : i32
    %c0_i32_0 = arith.constant 0 : i32
    return %c0_i32 : i32
  }
  func.func @transform_1(%arg0: i32) -> (i32, i32) {
    %c0_i32 = arith.constant 0 : i32
    %c0_i32_0 = arith.constant 0 : i32
    %c0_i32_1 = arith.constant 0 : i32
    return %c0_i32, %c0_i32_0 : i32, i32
  }
  func.func @transform_2(%arg0: i32) -> (i32, i32) {
    %c0_i32 = arith.constant 0 : i32
    %c0_i32_0 = arith.constant 0 : i32
    %c0_i32_1 = arith.constant 0 : i32
    return %c0_i32, %c0_i32_0 : i32, i32
  }
  func.func @transform_3(%arg0: i32) -> (i32, i32, i32) {
    %c0_i32 = arith.constant 0 : i32
    %c0_i32_0 = arith.constant 0 : i32
    %c0_i32_1 = arith.constant 0 : i32
    return %arg0, %c0_i32, %c0_i32_0 : i32, i32, i32
  }
  func.func @transform_4(%arg0: i32) -> (i32, i32, i32) {
    %c0_i32 = arith.constant 0 : i32
    %c0_i32_0 = arith.constant 0 : i32
    %c0_i32_1 = arith.constant 0 : i32
    return %arg0, %c0_i32, %c0_i32_0 : i32, i32, i32
  }
}

</mosaic_0001>

<bundles_post_ra>
// kernel: tpu_custom_call.1
= control target key start
LH: loop header
LB: loop body
LE: loop exit
PB: predicated region body
PF: predicated region fallthrough
CT: control target
= control target key end

     0   :  { %s1217_s0 = inlined_call_operand.<no memory space> [shape: f32[1], index: 0, kind: input, shape index: {}]   ;;  %s1218_s1 = inlined_call_operand.hbm [shape: f32[256,256], index: 1, kind: input, shape index: {}]   ;;  %s1219_s2 = inlined_call_operand.hbm [shape: f32[256,256], index: 2, kind: input, shape index: {}]   ;;  %s1220_s3 = inlined_call_operand.hbm [shape: f32[2,4,256], index: 3, kind: input, shape index: {}]   ;;  %s1221_s4 = inlined_call_operand.hbm [shape: f32[2,4,256], index: 4, kind: output, shape index: {}]  }
   0x1   :  { %9 = sst [smem:[#allocation2]] %s1217_s0 }
   0x2   :  { %10 = vsyncpa [#allocation4], 0 }
   0x3   :  { %11 = vsyncpa [#allocation7], 0 }
   0x4   :  { %12 = vsyncpa [#allocation5], 0 }
   0x5   :  { %14 = vsyncpa [#allocation5 + $0x1], 0  ;;  %s1037_s17 = smov 0   ;;  %s1039_s18 = smov 0  }
   0x6   :  { %s1041_s19 = smov 0   ;;  %s1043_s20 = smov 0  }
   0x7 LB: > { %s154_s22 = sshll.u32 %s1218_s1, 4  ;;  %s1061_s23 = sadd.s32 4294967295, %s1003_s20   ;;  %s1003_s20 = sphi %s1043_s20, %s1234_s20   ;;  %s999_s19 = sphi %s1041_s19, %s1233_s19   ;;  %s995_s18 = sphi %s1039_s18, %s1232_s18   ;;  %s991_s17 = sphi %s1037_s17, %s1231_s17   ;;  %s155_s22 = int_to_ptr.hbm [resolvable:$true] %s154_s22 }
   0x8   : > { %p732_p0 = scmp.ge.s32.totalorder %s1003_s20, 1  ;;  %p104_p1 = scmp.eq.s32.totalorder %s1061_s23, 0 }
   0x9   : > { %p127_p2 = scmp.eq.s32.totalorder %s1061_s23, 1  ;;  %p140_p3 = scmp.lt.s32.totalorder %s1003_s20, 3 }
   0xa   : > { %s1005_s25 = smov [#allocation3]   ;;  %s168_s29 = sshll.u32 %s1219_s2, 4  ;;  %s169_s29 = int_to_ptr.hbm [resolvable:$true] %s168_s29 }
   0xb   : > { %p1067_p4 = pnand %p732_p0, %p140_p3  ;;  %s156_s26 = sshll.u32 %s1005_s25, 4  ;;  %s157_s26 = int_to_ptr.vmem [resolvable:$true] %s156_s26 }
   0xc   : > { %s1006_s30 = smov [#allocation6]   ;;  %s1007_s6 = smov 256  }
   0xd   : > { %p774_p5 = pneg %p1067_p4  ;;  %s170_s5 = sshll.u32 %s1006_s30, 4  ;;  %s171_s5 = int_to_ptr.vmem [resolvable:$true] %s170_s5 }
   0xe   : > { %s1008_s7 = smov 16   ;;  %s731_s8 = sadd.s32 4294967294, %s1003_s20  }
   0xf   : > { %p775_p7 = pnand %p774_p5, %p104_p1  ;;  %s1081_s9 = sadd.s32 1, %s1003_s20  }
  0x10   : > { %s90_s10 = sadd.s32 1, %s999_s19  ;;  %s87_s11 = ssub.s32 %s1003_s20, %s1081_s9 }
  0x11   : > { %777 = dma.hbm_to_vmem [thread:$0]  (!%p775_p7), %s155_s22, 8192, %s157_s26, [#allocation4], %s1007_s6, %s1007_s6, %s1008_s7  }
  0x12   : > { %780 = dma.hbm_to_vmem [thread:$0]  (!%p775_p7), %s169_s29, 8192, %s171_s5, [#allocation7], %s1007_s6, %s1007_s6, %s1008_s7  }
  0x13   : > { %p97_p8 = scmp.ne.s32.totalorder %s999_s19, %s995_s18  ;;  %p88_p9 = scmp.eq.s32.totalorder %s87_s11, 0 }
  0x14   : > { %p98_p10 = scmp.eq.s32.totalorder %s1003_s20, 0  ;;  %p103_p11 = scmp.ne.s32.totalorder %s995_s18, %s991_s17 }
  0x15   : > { %p1093_p12 = por %p127_p2, %p97_p8  ;;  %p133_p3 = scmp.eq.s32.totalorder %s731_s8, 1 }
  0x16   : > { %s1098_s13 = scalar_select %p88_p9, %s999_s19, %s90_s10  }
  0x17   : > { %p1102_p13 = por %p104_p1, %p103_p11  ;;  %p1106_p0 = por %p98_p10, %p97_p8 }
  0x18   : > { %p791_p5 = scmp.lt.s32.totalorder %s1003_s20, 2  ;;  %s186_s16 = sand.u32 1, %s999_s19  }
  0x19   : > { %p1112_p7 = por %p133_p3, %p103_p11  ;;  %s184_s21 = sand.u32 1, %s1003_s20  }
  0x1a   : > { %s736_s22 = sshll.u32 %s186_s16, 3  ;;  %s760_s25 = sshll.u32 %s1003_s20, 3 }
  0x1b   : > { %s193_s28 = scalar_lea.hbm %s1220_s3, %s760_s25  ;;  %s188_s30 = scalar_lea.vmem [#allocation8], %s736_s22 }
  0x1c   : > { %s195_s29 = sshll.u32 %s193_s28, 4  ;;  %s197_s5 = sshll.u32 %s188_s30, 4  ;;  %s196_s29 = int_to_ptr.hbm [resolvable:$true] %s195_s29  ;;  %s198_s5 = int_to_ptr.vmem [resolvable:$true] %s197_s5 }
  0x1d   : > { %p1123_p2 = pnand %p791_p5, %p1106_p0  ;;  %s185_s7 = scalar_lea.sflag [#allocation4], %s184_s21 }
  0x1e   : > { %s899_s8 = sshra.s32 %s196_s29, 4  ;;  %s906_s22 = scalar_lea.hbm %s1220_s3, 16  ;;  %s900_s8 = int_to_ptr.hbm [resolvable:$true] %s899_s8 }
  0x1f   : > { %s901_s10 = scalar_lea.hbm %s900_s8, 8  ;;  %p903_p9 = pneg %p1123_p2 }
  0x20   : > { %p902_p8 = scmp.ne.s32.totalorder %s900_s8, %s901_s10  ;;  %p907_p0 = scmp.lt.s32.totalorder %s900_s8, %s1220_s3 }
  0x21   : > { %p908_p3 = scmp.lt.s32.totalorder %s906_s22, %s901_s10 }
  0x22   : > { %p904_p10 = pnand %p903_p9, %p902_p8 }
  0x23   : > { %p909_p5 = por %p908_p3, %p907_p0 }
  0x24   : > { %p905_p11 = pneg %p904_p10 }
  0x26   : > { %p910_p6 = pnand %p909_p5, %p905_p11 }
  0x28   : > { %913 = shalt.err (!%p910_p6)
}
  0x29   : > { %784 = dma.hbm_to_vmem [thread:$0]  (!%p1123_p2), %s196_s29, 128, %s198_s5, %s185_s7  }
  0x2a   : > { %206 = sbr.rel (%p1067_p4) target bundleno = 298 (0x12a), region = 36 }
  0x2f   : > { %974 = dma.done.wait (%p104_p1), [#allocation4], 8192  }
  0x30   : > { %976 = vsyncadd (%p104_p1), [#allocation4], 4294959104 }
  0x31   : > { %978 = dma.done.wait (%p104_p1), [#allocation7], 8192  }
  0x32   : > { %980 = vsyncadd (%p104_p1), [#allocation7], 4294959104  ;;  %s218_s21 = sand.u32 1, %s1061_s23   ;;  %s220_s26 = sand.u32 1, %s995_s18  }
  0x33   : > { %s1151_s24 = sshll.u32 %s220_s26, 3  ;;  %s219_s27 = scalar_lea.sflag [#allocation4], %s218_s21 }
  0x34   : > { %s1154_s28 = scalar_lea.vmem [#allocation8], %s1151_s24 }
  0x35   : > { %982 = dma.done.wait (%p1102_p13), %s219_s27, 128  }
  0x36   : > { %984 = vsyncadd (%p1102_p13), %s219_s27, 4294967168  ;;  %v355_v0 = vld [vmem:[#allocation6 + $0xf0] sm:$0xff]  ;;  %v356_v1 = vld [vmem:[#allocation6 + $0xf8] sm:$0xff]  ;;  %s559_s14 = sld [smem:[#allocation2]]  ;;  %s761_s29 = sshll.u32 %s1061_s23, 3  ;;  %vm604_vm7 = vcmask 1040384  }
  0x37   : > { %v353_v2 = vld [vmem:[#allocation6 + $0xe0] sm:$0xff]  ;;  %394 = vmatpush.msra.mxu0 %v355_v0  ;;  %434 = vmatpush.msra.mxu2 %v356_v1  ;;  %v387_v3 = vld [vmem:[#allocation6 + $0x1f0] sm:$0xff]  ;;  %v354_v4 = vld [vmem:[#allocation6 + $0xe8] sm:$0xff]  ;;  %s637_s6 = scalar_lea.hbm %s1221_s4, %s761_s29  ;;  %s247_s23 = scalar_lea.vmem [#allocation9], %s1151_s24 }
  0x38   : > { %v388_v5 = vld [vmem:[#allocation6 + $0x1f8] sm:$0xff]  ;;  %414 = vmatpush.msra.mxu1 %v387_v3  ;;  %v351_v6 = vld [vmem:[#allocation6 + $0xd0] sm:$0xff]  ;;  %v385_v7 = vld [vmem:[#allocation6 + $0x1e0] sm:$0xff]  ;;  %s639_s7 = sshll.u32 %s247_s23, 4  ;;  %s641_s8 = sshll.u32 %s637_s6, 4  ;;  %s640_s7 = int_to_ptr.vmem [resolvable:$true] %s639_s7  ;;  %s642_s8 = int_to_ptr.hbm [resolvable:$true] %s641_s8 }
  0x39   : > { %454 = vmatpush.msra.mxu3 %v388_v5  ;;  %v352_v8 = vld [vmem:[#allocation6 + $0xd8] sm:$0xff]  ;;  %395 = vmatpush.msra.mxu0 %v353_v2  ;;  %v386_v9 = vld [vmem:[#allocation6 + $0x1e8] sm:$0xff]  ;;  %v383_v10 = vld [vmem:[#allocation6 + $0x1d0] sm:$0xff]  ;;  %s626_s10 = scalar_lea.sflag [#allocation5], %s220_s26  ;;  %s943_s11 = sshra.s32 %s642_s8, 4  ;;  %s944_s11 = int_to_ptr.hbm [resolvable:$true] %s943_s11 }
  0x3a   : > { %435 = vmatpush.msra.mxu2 %v354_v4  ;;  %415 = vmatpush.msra.mxu1 %v385_v7  ;;  %v349_v11 = vld [vmem:[#allocation6 + $0xc0] sm:$0xff]  ;;  %v350_v12 = vld [vmem:[#allocation6 + $0xc8] sm:$0xff]  ;;  %v384_v13 = vld [vmem:[#allocation6 + $0x1d8] sm:$0xff]  ;;  %s945_s16 = scalar_lea.hbm %s944_s11, 8  ;;  %s949_s15 = scalar_lea.hbm %s1221_s4, 16 }
  0x3b   : > { %455 = vmatpush.msra.mxu3 %v386_v9  ;;  %396 = vmatpush.msra.mxu0 %v351_v6  ;;  %v381_v14 = vld [vmem:[#allocation6 + $0x1c0] sm:$0xff]  ;;  %v382_v15 = vld [vmem:[#allocation6 + $0x1c8] sm:$0xff]  ;;  %v347_v16 = vld [vmem:[#allocation6 + $0xb0] sm:$0xff]  ;;  %p946_p1 = scmp.ne.s32.totalorder %s944_s11, %s945_s16  ;;  %p950_p13 = scmp.lt.s32.totalorder %s944_s11, %s1221_s4 }
  0x3c   : > { %436 = vmatpush.msra.mxu2 %v352_v8  ;;  %416 = vmatpush.msra.mxu1 %v383_v10  ;;  %v348_v17 = vld [vmem:[#allocation6 + $0xb8] sm:$0xff]  ;;  %v379_v18 = vld [vmem:[#allocation6 + $0x1b0] sm:$0xff]  ;;  %v345_v20 = vld [vmem:[#allocation6 + $0xa0] sm:$0xff]  ;;  %p951_p2 = scmp.lt.s32.totalorder %s949_s15, %s945_s16 }
  0x3d   : > { %456 = vmatpush.msra.mxu3 %v384_v13  ;;  %397 = vmatpush.msra.mxu0 %v349_v11  ;;  %v380_v19 = vld [vmem:[#allocation6 + $0x1b8] sm:$0xff]  ;;  %v346_v21 = vld [vmem:[#allocation6 + $0xa8] sm:$0xff]  ;;  %v377_v22 = vld [vmem:[#allocation6 + $0x1a0] sm:$0xff]  ;;  %p947_p4 = pnand %p946_p1, %p1093_p12 }
  0x3e   : > { %437 = vmatpush.msra.mxu2 %v350_v12  ;;  %417 = vmatpush.msra.mxu1 %v381_v14  ;;  %v378_v23 = vld [vmem:[#allocation6 + $0x1a8] sm:$0xff]  ;;  %v343_v24 = vld [vmem:[#allocation6 + $0x90] sm:$0xff]  ;;  %v344_v25 = vld [vmem:[#allocation6 + $0x98] sm:$0xff]  ;;  %p952_p8 = por %p951_p2, %p950_p13 }
  0x3f   : > { %457 = vmatpush.msra.mxu3 %v382_v15  ;;  %398 = vmatpush.msra.mxu0 %v347_v16  ;;  %v375_v26 = vld [vmem:[#allocation6 + $0x190] sm:$0xff]  ;;  %v376_v27 = vld [vmem:[#allocation6 + $0x198] sm:$0xff]  ;;  %v341_v28 = vld [vmem:[#allocation6 + $0x80] sm:$0xff]  ;;  %p948_p6 = pneg %p947_p4 }
  0x40   : > { %438 = vmatpush.msra.mxu2 %v348_v17  ;;  %418 = vmatpush.msra.mxu1 %v379_v18  ;;  %v342_v29 = vld [vmem:[#allocation6 + $0x88] sm:$0xff]  ;;  %v373_v30 = vld [vmem:[#allocation6 + $0x180] sm:$0xff]  ;;  %v339_v32 = vld [vmem:[#allocation6 + $0x70] sm:$0xff] }
  0x41   : > { %458 = vmatpush.msra.mxu3 %v380_v19  ;;  %399 = vmatpush.msra.mxu0 %v345_v20  ;;  %v374_v31 = vld [vmem:[#allocation6 + $0x188] sm:$0xff]  ;;  %v340_v33 = vld [vmem:[#allocation6 + $0x78] sm:$0xff]  ;;  %v371_v34 = vld [vmem:[#allocation6 + $0x170] sm:$0xff]  ;;  %p953_p9 = pnand %p952_p8, %p948_p6 }
  0x42   : > { %439 = vmatpush.msra.mxu2 %v346_v21  ;;  %419 = vmatpush.msra.mxu1 %v377_v22  ;;  %v372_v35 = vld [vmem:[#allocation6 + $0x178] sm:$0xff]  ;;  %v337_v36 = vld [vmem:[#allocation6 + $0x60] sm:$0xff]  ;;  %v338_v37 = vld [vmem:[#allocation6 + $0x68] sm:$0xff] }
  0x43   : > { %459 = vmatpush.msra.mxu3 %v378_v23  ;;  %400 = vmatpush.msra.mxu0 %v343_v24  ;;  %v369_v38 = vld [vmem:[#allocation6 + $0x160] sm:$0xff]  ;;  %v370_v39 = vld [vmem:[#allocation6 + $0x168] sm:$0xff]  ;;  %v335_v40 = vld [vmem:[#allocation6 + $0x50] sm:$0xff] }
  0x44   : > { %440 = vmatpush.msra.mxu2 %v344_v25  ;;  %420 = vmatpush.msra.mxu1 %v375_v26  ;;  %v336_v41 = vld [vmem:[#allocation6 + $0x58] sm:$0xff]  ;;  %v367_v42 = vld [vmem:[#allocation6 + $0x150] sm:$0xff]  ;;  %v333_v44 = vld [vmem:[#allocation6 + $0x40] sm:$0xff] }
  0x45   : > { %460 = vmatpush.msra.mxu3 %v376_v27  ;;  %401 = vmatpush.msra.mxu0 %v341_v28  ;;  %v368_v43 = vld [vmem:[#allocation6 + $0x158] sm:$0xff]  ;;  %v334_v45 = vld [vmem:[#allocation6 + $0x48] sm:$0xff]  ;;  %v365_v46 = vld [vmem:[#allocation6 + $0x140] sm:$0xff] }
  0x46   : > { %441 = vmatpush.msra.mxu2 %v342_v29  ;;  %421 = vmatpush.msra.mxu1 %v373_v30  ;;  %v366_v47 = vld [vmem:[#allocation6 + $0x148] sm:$0xff]  ;;  %v331_v48 = vld [vmem:[#allocation6 + $0x30] sm:$0xff]  ;;  %v332_v49 = vld [vmem:[#allocation6 + $0x38] sm:$0xff] }
  0x47   : > { %461 = vmatpush.msra.mxu3 %v374_v31  ;;  %402 = vmatpush.msra.mxu0 %v339_v32  ;;  %v363_v50 = vld [vmem:[#allocation6 + $0x130] sm:$0xff]  ;;  %v364_v51 = vld [vmem:[#allocation6 + $0x138] sm:$0xff]  ;;  %v329_v52 = vld [vmem:[#allocation6 + $0x20] sm:$0xff] }
  0x48   : > { %442 = vmatpush.msra.mxu2 %v340_v33  ;;  %422 = vmatpush.msra.mxu1 %v371_v34  ;;  %v330_v53 = vld [vmem:[#allocation6 + $0x28] sm:$0xff]  ;;  %v361_v54 = vld [vmem:[#allocation6 + $0x120] sm:$0xff]  ;;  %v327_v56 = vld [vmem:[#allocation6 + $0x10] sm:$0xff] }
  0x49   : > { %462 = vmatpush.msra.mxu3 %v372_v35  ;;  %403 = vmatpush.msra.mxu0 %v337_v36  ;;  %v362_v55 = vld [vmem:[#allocation6 + $0x128] sm:$0xff]  ;;  %v328_v57 = vld [vmem:[#allocation6 + $0x18] sm:$0xff]  ;;  %v359_v58 = vld [vmem:[#allocation6 + $0x110] sm:$0xff] }
  0x4a   : > { %443 = vmatpush.msra.mxu2 %v338_v37  ;;  %423 = vmatpush.msra.mxu1 %v369_v38  ;;  %v360_v59 = vld [vmem:[#allocation6 + $0x118] sm:$0xff]  ;;  %v325_v60 = vld [vmem:[#allocation6] sm:$0xff]  ;;  %v326_v61 = vld [vmem:[#allocation6 + $0x8] sm:$0xff] }
  0x4b   : > { %463 = vmatpush.msra.mxu3 %v370_v39  ;;  %404 = vmatpush.msra.mxu0 %v335_v40  ;;  %v291_v62 = vld [vmem:[#allocation3 + $0xf0] sm:$0xff]  ;;  %v292_v63 = vld [vmem:[#allocation3 + $0xf8] sm:$0xff]  ;;  %v357_v0 = vld [vmem:[#allocation6 + $0x100] sm:$0xff] }
  0x4c   : > { %444 = vmatpush.msra.mxu2 %v336_v41  ;;  %424 = vmatpush.msra.mxu1 %v367_v42  ;;  %v358_v1 = vld [vmem:[#allocation6 + $0x108] sm:$0xff]  ;;  %v289_v2 = vld [vmem:[#allocation3 + $0xe0] sm:$0xff]  ;;  %v323_v3 = vld [vmem:[#allocation3 + $0x1f0] sm:$0xff] }
  0x4d   : > { %464 = vmatpush.msra.mxu3 %v368_v43  ;;  %405 = vmatpush.msra.mxu0 %v333_v44  ;;  %v290_v4 = vld [vmem:[#allocation3 + $0xe8] sm:$0xff]  ;;  %v324_v5 = vld [vmem:[#allocation3 + $0x1f8] sm:$0xff]  ;;  %v287_v6 = vld [vmem:[#allocation3 + $0xd0] sm:$0xff] }
  0x4e   : > { %445 = vmatpush.msra.mxu2 %v334_v45  ;;  %425 = vmatpush.msra.mxu1 %v365_v46  ;;  %v321_v7 = vld [vmem:[#allocation3 + $0x1e0] sm:$0xff]  ;;  %v288_v8 = vld [vmem:[#allocation3 + $0xd8] sm:$0xff]  ;;  %v322_v9 = vld [vmem:[#allocation3 + $0x1e8] sm:$0xff] }
  0x4f   : > { %465 = vmatpush.msra.mxu3 %v366_v47  ;;  %406 = vmatpush.msra.mxu0 %v331_v48  ;;  %v285_v10 = vld [vmem:[#allocation3 + $0xc0] sm:$0xff]  ;;  %v319_v11 = vld [vmem:[#allocation3 + $0x1d0] sm:$0xff]  ;;  %v286_v12 = vld [vmem:[#allocation3 + $0xc8] sm:$0xff] }
  0x50   : > { %446 = vmatpush.msra.mxu2 %v332_v49  ;;  %426 = vmatpush.msra.mxu1 %v363_v50  ;;  %v320_v13 = vld [vmem:[#allocation3 + $0x1d8] sm:$0xff]  ;;  %v283_v14 = vld [vmem:[#allocation3 + $0xb0] sm:$0xff]  ;;  %v317_v15 = vld [vmem:[#allocation3 + $0x1c0] sm:$0xff] }
  0x51   : > { %466 = vmatpush.msra.mxu3 %v364_v51  ;;  %407 = vmatpush.msra.mxu0 %v329_v52  ;;  %v1161_v16 = vld [vmem:[%s1154_s28] ss:$4 sm:$0x3]  ;;  %v1164_v17 = vld [vmem:[%s1154_s28 + $0x1] ss:$4 sm:$0x3] }
  0x52   : > { %447 = vmatpush.msra.mxu2 %v330_v53  ;;  %427 = vmatpush.msra.mxu1 %v361_v54  ;;  %v284_v18 = vld [vmem:[#allocation3 + $0xb8] sm:$0xff]  ;;  %v318_v19 = vld [vmem:[#allocation3 + $0x1c8] sm:$0xff]  ;;  %v281_v20 = vld [vmem:[#allocation3 + $0xa0] sm:$0xff]  ;;  %v252_v24 = vadd.f32 %v1164_v17, %v1161_v16  ;;  %v251_v49 = vmax.f32 %v1161_v16, %v1164_v17 }
  0x53   : > { %467 = vmatpush.msra.mxu3 %v362_v55  ;;  %408 = vmatpush.msra.mxu0 %v327_v56  ;;  %v315_v21 = vld [vmem:[#allocation3 + $0x1b0] sm:$0xff]  ;;  %v282_v22 = vld [vmem:[#allocation3 + $0xa8] sm:$0xff]  ;;  %v316_v23 = vld [vmem:[#allocation3 + $0x1b8] sm:$0xff] }
  0x54   : > { %448 = vmatpush.msra.mxu2 %v328_v57  ;;  %428 = vmatpush.msra.mxu1 %v359_v58  ;;  %v279_v25 = vld [vmem:[#allocation3 + $0x90] sm:$0xff]  ;;  %v313_v26 = vld [vmem:[#allocation3 + $0x1a0] sm:$0xff]  ;;  %v280_v28 = vld [vmem:[#allocation3 + $0x98] sm:$0xff] }
  0x55   : > { %468 = vmatpush.msra.mxu3 %v360_v59  ;;  %409 = vmatpush.msra.mxu0 %v325_v60  ;;  %v745_v27 = vld [vmem:[%s1154_s28 + $0x2] ss:$4 sm:$0x3]  ;;  %v311_v31 = vld [vmem:[#allocation3 + $0x190] sm:$0xff]  ;;  %v312_v33 = vld [vmem:[#allocation3 + $0x198] sm:$0xff] }
  0x56   : > { %449 = vmatpush.msra.mxu2 %v326_v61  ;;  %429 = vmatpush.msra.mxu1 %v357_v0  ;;  %v314_v29 = vld [vmem:[#allocation3 + $0x1a8] sm:$0xff]  ;;  %v277_v30 = vld [vmem:[#allocation3 + $0x80] sm:$0xff]  ;;  %v256_v34 = vadd.f32 %v745_v27, %v252_v24  ;;  %v275_v35 = vld [vmem:[#allocation3 + $0x70] sm:$0xff]  ;;  %v255_v56 = vmax.f32 %v251_v49, %v745_v27 }
  0x57   : > { %479 = vmatpush.msrb.mxu0 %v291_v62  ;;  %469 = vmatpush.msra.mxu3 %v358_v1  ;;  %v278_v32 = vld [vmem:[#allocation3 + $0x88] sm:$0xff]  ;;  %v309_v36 = vld [vmem:[#allocation3 + $0x180] sm:$0xff]  ;;  %v276_v38 = vld [vmem:[#allocation3 + $0x78] sm:$0xff] }
  0x58   : > { %519 = vmatpush.msrb.mxu2 %v292_v63  ;;  %499 = vmatpush.msrb.mxu1 %v323_v3  ;;  %v746_v37 = vld [vmem:[%s1154_s28 + $0x3] ss:$4 sm:$0x3]  ;;  %v307_v41 = vld [vmem:[#allocation3 + $0x170] sm:$0xff]  ;;  %v308_v43 = vld [vmem:[#allocation3 + $0x178] sm:$0xff] }
  0x59   : > { %480 = vmatpush.msrb.mxu0 %v289_v2  ;;  %539 = vmatpush.msrb.mxu3 %v324_v5  ;;  %v310_v39 = vld [vmem:[#allocation3 + $0x188] sm:$0xff]  ;;  %v273_v40 = vld [vmem:[#allocation3 + $0x60] sm:$0xff]  ;;  %v260_v44 = vadd.f32 %v746_v37, %v256_v34  ;;  %v271_v45 = vld [vmem:[#allocation3 + $0x50] sm:$0xff]  ;;  %v259_v63 = vmax.f32 %v255_v56, %v746_v37  ;;  %v608_v56 = vlaneseq }
  0x5a   : > { %520 = vmatpush.msrb.mxu2 %v290_v4  ;;  %500 = vmatpush.msrb.mxu1 %v321_v7  ;;  %v274_v42 = vld [vmem:[#allocation3 + $0x68] sm:$0xff]  ;;  %v305_v46 = vld [vmem:[#allocation3 + $0x160] sm:$0xff]  ;;  %v272_v47 = vld [vmem:[#allocation3 + $0x58] sm:$0xff] }
  0x5b   : > { %481 = vmatpush.msrb.mxu0 %v287_v6  ;;  %540 = vmatpush.msrb.mxu3 %v322_v9  ;;  %v306_v48 = vld [vmem:[#allocation3 + $0x168] sm:$0xff]  ;;  %v269_v50 = vld [vmem:[#allocation3 + $0x40] sm:$0xff]  ;;  %v303_v51 = vld [vmem:[#allocation3 + $0x150] sm:$0xff]  ;;  %v390_v54 = vperm.slane %v260_v44, 0  ;;  %v391_v55 = vperm.slane %v260_v44, 1  ;;  %vm610_vm9 = vcmp.lt.s32.totalorder %v608_v56, 256 }
  0x5c   : > { %521 = vmatpush.msrb.mxu2 %v288_v8  ;;  %501 = vmatpush.msrb.mxu1 %v319_v11  ;;  %v270_v52 = vld [vmem:[#allocation3 + $0x48] sm:$0xff]  ;;  %v304_v53 = vld [vmem:[#allocation3 + $0x158] sm:$0xff]  ;;  %v267_v57 = vld [vmem:[#allocation3 + $0x30] sm:$0xff] }
  0x5d   : > { %482 = vmatpush.msrb.mxu0 %v285_v10  ;;  %541 = vmatpush.msrb.mxu3 %v320_v13  ;;  %v301_v58 = vld [vmem:[#allocation3 + $0x140] sm:$0xff]  ;;  %v268_v59 = vld [vmem:[#allocation3 + $0x38] sm:$0xff]  ;;  %v302_v60 = vld [vmem:[#allocation3 + $0x148] sm:$0xff]  ;;  %v475_v10 = vperm.slane %v259_v63, 0  ;;  %v476_v13 = vperm.slane %v259_v63, 1 }
  0x5e   : > { %522 = vmatpush.msrb.mxu2 %v286_v12  ;;  %502 = vmatpush.msrb.mxu1 %v317_v15  ;;  %v265_v61 = vld [vmem:[#allocation3 + $0x20] sm:$0xff]  ;;  %v299_v62 = vld [vmem:[#allocation3 + $0x130] sm:$0xff]  ;;  %v266_v0 = vld [vmem:[#allocation3 + $0x28] sm:$0xff] }
  0x5f   : > { %483 = vmatpush.msrb.mxu0 %v283_v14  ;;  %542 = vmatpush.msrb.mxu3 %v318_v19  ;;  %v300_v1 = vld [vmem:[#allocation3 + $0x138] sm:$0xff]  ;;  %v263_v2 = vld [vmem:[#allocation3 + $0x10] sm:$0xff]  ;;  %v297_v3 = vld [vmem:[#allocation3 + $0x120] sm:$0xff] }
  0x60   : > { %523 = vmatpush.msrb.mxu2 %v284_v18  ;;  %503 = vmatpush.msrb.mxu1 %v315_v21  ;;  %v264_v4 = vld [vmem:[#allocation3 + $0x18] sm:$0xff]  ;;  %v298_v5 = vld [vmem:[#allocation3 + $0x128] sm:$0xff]  ;;  %v261_v6 = vld [vmem:[#allocation3] sm:$0xff] }
  0x61   : > { %484 = vmatpush.msrb.mxu0 %v281_v20  ;;  %543 = vmatpush.msrb.mxu3 %v316_v23  ;;  %v295_v7 = vld [vmem:[#allocation3 + $0x110] sm:$0xff]  ;;  %v262_v8 = vld [vmem:[#allocation3 + $0x8] sm:$0xff]  ;;  %v296_v9 = vld [vmem:[#allocation3 + $0x118] sm:$0xff]  ;;  %v560_v23 = vstv %s559_s14 }
  0x62   : > { %524 = vmatpush.msrb.mxu2 %v282_v22  ;;  %504 = vmatpush.msrb.mxu1 %v313_v26  ;;  %v293_v11 = vld [vmem:[#allocation3 + $0x100] sm:$0xff]  ;;  %v294_v12 = vld [vmem:[#allocation3 + $0x108] sm:$0xff] }
  0x63   : > { %485 = vmatpush.msrb.mxu0 %v279_v25  ;;  %544 = vmatpush.msrb.mxu3 %v314_v29  ;;  %v753_v63 = vld [vmem:[%s1154_s28 + $0x3] ss:$4 sm:$0x3] }
  0x64   : > { %525 = vmatpush.msrb.mxu2 %v280_v28  ;;  %505 = vmatpush.msrb.mxu1 %v311_v31 }
  0x65   : > { %486 = vmatpush.msrb.mxu0 %v277_v30  ;;  %545 = vmatpush.msrb.mxu3 %v312_v33 }
  0x66   : > { %526 = vmatpush.msrb.mxu2 %v278_v32  ;;  %506 = vmatpush.msrb.mxu1 %v309_v36 }
  0x67   : > { %487 = vmatpush.msrb.mxu0 %v275_v35  ;;  %546 = vmatpush.msrb.mxu3 %v310_v39 }
  0x68   : > { %527 = vmatpush.msrb.mxu2 %v276_v38  ;;  %507 = vmatpush.msrb.mxu1 %v307_v41 }
  0x69   : > { %488 = vmatpush.msrb.mxu0 %v273_v40  ;;  %547 = vmatpush.msrb.mxu3 %v308_v43 }
  0x6a   : > { %528 = vmatpush.msrb.mxu2 %v274_v42  ;;  %508 = vmatpush.msrb.mxu1 %v305_v46 }
  0x6b   : > { %489 = vmatpush.msrb.mxu0 %v271_v45  ;;  %548 = vmatpush.msrb.mxu3 %v306_v48 }
  0x6c   : > { %529 = vmatpush.msrb.mxu2 %v272_v47  ;;  %509 = vmatpush.msrb.mxu1 %v303_v51 }
  0x6d   : > { %490 = vmatpush.msrb.mxu0 %v269_v50  ;;  %549 = vmatpush.msrb.mxu3 %v304_v53 }
  0x6e   : > { %530 = vmatpush.msrb.mxu2 %v270_v52  ;;  %410 = vmatmul.f32.vlgmr.msra.gmra.mxu0 %v390_v54 }
  0x6f   : > { %450 = vmatmul.f32.vlgmr.msra.gmra.mxu2 %v390_v54  ;;  %470 = vmatmul.f32.vlgmr.msra.gmra.mxu3 %v391_v55 }
  0x70   : > { %491 = vmatpush.msrb.mxu0 %v267_v57  ;;  %510 = vmatpush.msrb.mxu1 %v301_v58 }
  0x71   : > { %531 = vmatpush.msrb.mxu2 %v268_v59  ;;  %550 = vmatpush.msrb.mxu3 %v302_v60  ;;  %v749_v59 = vld [vmem:[%s1154_s28 + $0x1] ss:$4 sm:$0x3] }
  0x72   : > { %430 = vmatmul.f32.vlgmr.msra.gmra.mxu1 %v391_v55  ;;  %492 = vmatpush.msrb.mxu0 %v265_v61  ;;  %v751_v61 = vld [vmem:[%s1154_s28 + $0x2] ss:$4 sm:$0x3] }
  0x73   : > { %511 = vmatpush.msrb.mxu1 %v299_v62  ;;  %532 = vmatpush.msrb.mxu2 %v266_v0 }
  0x74   : > { %551 = vmatpush.msrb.mxu3 %v300_v1  ;;  %493 = vmatpush.msrb.mxu0 %v263_v2 }
  0x75   : > { %512 = vmatpush.msrb.mxu1 %v297_v3  ;;  %533 = vmatpush.msrb.mxu2 %v264_v4 }
  0x76   : > { %552 = vmatpush.msrb.mxu3 %v298_v5  ;;  %494 = vmatpush.msrb.mxu0 %v261_v6 }
  0x77   : > { %513 = vmatpush.msrb.mxu1 %v295_v7  ;;  %534 = vmatpush.msrb.mxu2 %v262_v8 }
  0x78   : > { %553 = vmatpush.msrb.mxu3 %v296_v9  ;;  %495 = vmatmul.f32.vlgmr.msrb.gmra.mxu0 %v475_v10 }
  0x79   : > { %535 = vmatmul.f32.vlgmr.msrb.gmra.mxu2 %v475_v10  ;;  %514 = vmatpush.msrb.mxu1 %v293_v11 }
  0x7a   : > { %554 = vmatpush.msrb.mxu3 %v294_v12  ;;  %515 = vmatmul.f32.vlgmr.msrb.gmra.mxu1 %v476_v13 }
  0x7b   : > { %555 = vmatmul.f32.vlgmr.msrb.gmra.mxu3 %v476_v13 }
  0xeb   : > { %v411_v14 = vpop.f32.mrf.mxu0 }
  0xef   : > { %v431_v15 = vpop.f32.mrf.mxu1 }
  0xf0   : > { %v432_v18 = vadd.f32 %v431_v15, %v411_v14 }
  0xf2   : > { %v451_v17 = vpop.f32.mrf.mxu2  ;;  %v471_v19 = vpop.f32.mrf.mxu3 }
  0xf3   : > { %v472_v25 = vadd.f32 %v471_v19, %v451_v17 }
  0xf5   : > { %v496_v20 = vpop.f32.mrf.mxu0 }
  0xf6   : > { %v497_v21 = vadd.f32 %v496_v20, %v432_v18 }
  0xf7   : > { %v516_v22 = vpop.f32.mrf.mxu1 }
  0xf8   : > { %v517_v24 = vadd.f32 %v516_v22, %v497_v21 }
  0xfa   : > { %v561_v26 = vadd.f32 %v560_v23, %v517_v24 }
  0xfc   : > { %v536_v27 = vpop.f32.mrf.mxu2  ;;  %v747_v28 = vmul.f32 -1.442695, %v561_v26 }
  0xfd   : > { %v537_v29 = vadd.f32 %v536_v27, %v472_v25 }
  0xfe   : > { %v556_v30 = vpop.f32.mrf.mxu3  ;;  %831 = vpow2.f32 %v747_v28 }
  0xff   : > { %v557_v31 = vadd.f32 %v556_v30, %v537_v29 }
 0x101   : > { %v562_v32 = vadd.f32 %v560_v23, %v557_v31 }
 0x103   : > { %v748_v33 = vmul.f32 -1.442695, %v562_v32 }
 0x104   : > { %v832_v34 = vpop.eup %831 }
 0x105   : > { %833 = vpow2.f32 %v748_v33  ;;  %v569_v35 = vadd.f32 1.0, %v832_v34 }
 0x107   : > { %835 = vrcp.f32 %v569_v35  ;;  %vm576_vm2 = vweird.f32 %v569_v35  ;;  %v582_v49 = vand.u32 2147483648, %v569_v35  ;;  %v580_v51 = vand.u32 2147483647, %v569_v35 }
 0x109   : > { %v583_v57 = vor.u32 1.1754944e-38, %v582_v49  ;;  %vm581_vm8 = vcmp.eq.f32.partialorder %v580_v51, 8.507059e+37 }
 0x10b   : > { %v834_v36 = vpop.eup %833 }
 0x10c   : > { %v570_v37 = vadd.f32 1.0, %v834_v36 }
 0x10d   : > { %v836_v38 = vpop.eup %835 }
 0x10e   : > { %837 = vrcp.f32 %v570_v37  ;;  %v572_v39 = vmul.f32 %v836_v38, %v569_v35  ;;  %vm577_vm0 = vweird.f32 %v836_v38  ;;  %v597_v45 = vand.u32 2147483648, %v570_v37 }
 0x10f   : > { %v595_v48 = vand.u32 2147483647, %v570_v37  ;;  %vm1172_vm3 = vmor %vm576_vm2, %vm577_vm0  ;;  %vm591_vm4 = vweird.f32 %v570_v37 }
 0x110   : > { %v573_v40 = vsub.f32 1.0, %v572_v39  ;;  %v598_v53 = vor.u32 1.1754944e-38, %v597_v45 }
 0x111   : > { %vm596_vm6 = vcmp.eq.f32.partialorder %v595_v48, 8.507059e+37 }
 0x112   : > { %v574_v42 = vmul.f32 %v836_v38, %v573_v40 }
 0x114   : > { %v838_v41 = vpop.eup %837  ;;  %v575_v46 = vadd.f32 %v836_v38, %v574_v42 }
 0x115   : > { %v587_v43 = vmul.f32 %v838_v41, %v570_v37  ;;  %vm592_vm1 = vweird.f32 %v838_v41 }
 0x116   : > { %vm593_vm5 = vmor %vm591_vm4, %vm592_vm1  ;;  %v579_v54 = vsel %vm1172_vm3, %v836_v38, %v575_v46 }
 0x117   : > { %v588_v44 = vsub.f32 1.0, %v587_v43  ;;  %v584_v62 = vsel %vm581_vm8, %v583_v57, %v579_v54 }
 0x119   : > { %v589_v47 = vmul.f32 %v838_v41, %v588_v44 }
 0x11b   : > { %v590_v52 = vadd.f32 %v838_v41, %v589_v47 }
 0x11d   : > { %v594_v55 = vsel %vm593_vm5, %v838_v41, %v590_v52 }
 0x11e   : > { %v599_v58 = vsel %vm596_vm6, %v598_v53, %v594_v55 }
 0x11f   : > { %v603_v60 = vrot.slane %v599_v58, 7 }
 0x121   : > { %v605_v0 = vsel %vm604_vm7, %v584_v62, %v603_v60 }
 0x122   : > { %v607_v1 = vmul.f32 %v605_v0, %v1161_v16  ;;  %v614_v2 = vmul.f32 %v749_v59, %v605_v0  ;;  %v618_v3 = vmul.f32 %v751_v61, %v605_v0  ;;  %v622_v4 = vmul.f32 %v753_v63, %v605_v0 }
 0x124   : > { %612 = vst.msk [vmem:[%s247_s23] ss:$4 sm:$0x3] %vm610_vm9, %v607_v1 }
 0x125   : > { %750 = vst.msk [vmem:[%s247_s23 + $0x1] ss:$4 sm:$0x3] %vm610_vm9, %v614_v2 }
 0x126   : > { %752 = vst.msk [vmem:[%s247_s23 + $0x2] ss:$4 sm:$0x3] %vm610_vm9, %v618_v3 }
 0x127   : > { %754 = vst.msk [vmem:[%s247_s23 + $0x3] ss:$4 sm:$0x3] %vm610_vm9, %v622_v4 }
 0x128   : > { %956 = shalt.err (!%p953_p9)
}
 0x129   : > { %772 = dma.vmem_to_hbm [thread:$0]  (%p1093_p12), %s640_s7, 128, %s642_s8, %s626_s10  }
 0x12a PF: > { %s653_s26 = sand.u32 1, %s991_s17   ;;  %p1230_p10 = scmp.ge.s32.totalorder %s1003_s20, 2 }
 0x12b   : > { %s654_s27 = scalar_lea.sflag [#allocation5], %s653_s26 }
 0x12c   : > { %p786_p11 = pnand %p1230_p10, %p1112_p7 }
 0x12e   : > { %p787_p0 = pneg %p786_p11 }
 0x130   : > { %986 = dma.done.wait (%p787_p0), %s654_s27, 128  }
 0x131   : > { %988 = vsyncadd (%p787_p0), %s654_s27, 4294967168  ;;  %p17_p3 = scmp.ge.s32.totalorder %s1081_s9, 4   ;;  %s1231_s17 = smov %s995_s18 }
 0x132   : > { %s1232_s18 = smov %s999_s19  ;;  %s1233_s19 = smov %s1098_s13 }
 0x133   : > { %s1234_s20 = smov %s1081_s9  ;;  %19 = sbr.rel (!%p17_p3) target bundleno = 7 (0x7), region = 94 }
 0x138   :  { %660 = vsyncpa [#allocation4], 1 }
 0x139   :  { %662 = vsyncpa [#allocation4 + $0x1], 1 }
 0x13a   :  { %663 = vsyncpa [#allocation7], 1 }
 0x13b   :  { %664 = vsyncpa [#allocation5], 1 }
 0x13c   :  { %666 = vsyncpa [#allocation5 + $0x1], 1 }

</bundles_post_ra>
